<compile_context>
chip_gen: v7x
topology: tpu7x:2x2x1
jax: 0.10.0
libtpu: 0.0.40
codegen_flags: <defaults>
</compile_context>

<pallas_src>
import math

import jax
import jax.numpy as jnp
from jax import lax
from jax.experimental import pallas as pl
from jax.experimental.pallas import tpu as pltpu


# ----------------------------------------------------------------------------
# Parameter construction (mirrors RedistributionNetwork.__init__)
# ----------------------------------------------------------------------------
def build_params(nX, nY, initial_storage_data, input_scale):
    """Deterministically build the module's parameters as JAX arrays."""
    if nY % 8 > 0:
        nYpad = nY - nY % 8 + 8
    else:
        nYpad = nY

    weights = []
    for x in range(nX):
        w = jnp.zeros((nYpad, nYpad), dtype=jnp.float32)
        if x < nX - 1:
            for y in range(nY):
                if y > 0:
                    w = w.at[y - 1, y].set(0.01)
                w = w.at[y, y].set(0.1)
                if y < nY - 1:
                    w = w.at[y + 1, y].set(0.01)
        weights.append(w)
    weights = jnp.stack(weights, axis=0)  # (nX, nYpad, nYpad)

    initial_storage = jnp.zeros((nYpad, nX), dtype=jnp.float32)
    initial_storage = initial_storage.at[:nY, :].set(
        jnp.asarray(initial_storage_data, dtype=jnp.float32))

    params = dict(
        efficiency=jnp.float32(1.0),
        input_scale=jnp.float32(input_scale),
        weights=weights,
        initial_storage=initial_storage,
        nYpad=nYpad,
    )
    return params


# ----------------------------------------------------------------------------
# Pallas kernel: single invocation, fully-unrolled chain  x <- x @ W_k^T
# ----------------------------------------------------------------------------
def _chain_linear_kernel(x_ref, w_ref, o_ref):
    nX = w_ref.shape[0]                       # static
    acc = x_ref[...].astype(jnp.float32)      # read x exactly once

    # Fully unrolled at trace time (nX is a small static int).  dot_general
    # contracts the last axis of the activation with the last axis of W_k,
    # which is exactly y = x @ W_k^T -- no transpose anywhere.
    for k in range(nX):
        acc = lax.dot_general(
            acc, w_ref[k],
            dimension_numbers=(((1,), (1,)), ((), ())),
            preferred_element_type=jnp.float32)

    o_ref[...] = acc.astype(o_ref.dtype)


def redistribution_forward(x, weights):
    """x: (B, nYpad) float32, weights: (nX, nYpad, nYpad) float32."""
    B, nYpad = x.shape
    nX, wy0, wy1 = weights.shape
    assert wy0 == nYpad and wy1 == nYpad

    # Sublane density: pad the batch to a multiple of 8 (one vreg = 8 sublanes).
    Bpad = ((B + 7) // 8) * 8
    if Bpad != B:
        x_in = jnp.zeros((Bpad, nYpad), dtype=jnp.float32).at[:B].set(x)
    else:
        x_in = x.astype(jnp.float32)

    # No grid: whole x, all nX weight matrices and the output are resident in
    # VMEM for the single kernel invocation (tiny footprint at these sizes:
    # nX*nYpad^2*4 B + 2*Bpad*nYpad*4 B << 1 MiB).
    out = pl.pallas_call(
        _chain_linear_kernel,
        out_shape=jax.ShapeDtypeStruct((Bpad, nYpad), jnp.float32),
        in_specs=[
            pl.BlockSpec(memory_space=pltpu.MemorySpace.VMEM),
            pl.BlockSpec(memory_space=pltpu.MemorySpace.VMEM),
        ],
        out_specs=pl.BlockSpec(memory_space=pltpu.MemorySpace.VMEM),
    )(x_in, weights.astype(jnp.float32))

    return out[:B].astype(x.dtype)


# ----------------------------------------------------------------------------
# Pure-JAX reference (same semantics as the PyTorch forward)
# ----------------------------------------------------------------------------
def forward_ref(x, weights):
    for k in range(weights.shape[0]):
        x = x @ weights[k].T
    return x


if __name__ == "__main__":
    # Small deterministic setup consistent with the module.
    nX, nY = 4, 10          # nYpad -> 16
    B = 2
    input_scale = 1.0

    key = jax.random.PRNGKey(0)
    k_store, k_x, k_w = jax.random.split(key, 3)
    initial_storage_data = jax.random.uniform(k_store, (nY, nX), dtype=jnp.float32)

    params = build_params(nX, nY, initial_storage_data, input_scale)
    nYpad = params["nYpad"]

    x = jax.random.normal(k_x, (B, nYpad), dtype=jnp.float32)

    # (1) Module-faithful weights (note: the PyTorch init leaves the last
    #     layer's weight all-zero, so the forward output is identically zero).
    out = jax.block_until_ready(redistribution_forward(x, params["weights"]))
    ref = forward_ref(x, params["weights"])
    assert out.shape == (B, nYpad)
    assert jnp.allclose(out, ref, atol=1e-5, rtol=1e-5)

    # (2) Non-trivial check of the same kernel with random dense weights
    #     (exercises the real chained-matmul path, not just zeros-vs-zeros).
    w_rand = 0.1 * jax.random.normal(k_w, (nX, nYpad, nYpad), dtype=jnp.float32)
    out_r = jax.block_until_ready(redistribution_forward(x, w_rand))
    ref_r = forward_ref(x, w_rand)
    assert jnp.allclose(out_r, ref_r, atol=1e-4, rtol=1e-4)

    # TODO(synk): compute_storage_and_cost / compute_storage_and_flux are
    # auxiliary methods (not forward) and are not implemented here.

    print("KERNEL_OK")
</pallas_src>

<mosaic_0001>
module attributes {stable_mosaic.version = 11 : i64} {
  func.func @_chain_linear_kernel(%arg0: memref<8x16xf32, #tpu.memory_space<vmem>>, %arg1: memref<4x16x16xf32, #tpu.memory_space<vmem>>, %arg2: memref<8x16xf32, #tpu.memory_space<vmem>>) attributes {dimension_semantics = [], scalar_prefetch = 0 : i64, scratch_operands = 0 : i64, tpu.core_type = #tpu.core_type<tc>} {
    %c0 = arith.constant 0 : index
    %c0_0 = arith.constant 0 : index
    %0 = vector.load %arg0[%c0, %c0_0] : memref<8x16xf32, #tpu.memory_space<vmem>>, vector<8x16xf32>
    %c0_1 = arith.constant 0 : index
    %c0_2 = arith.constant 0 : index
    %c0_3 = arith.constant 0 : index
    %1 = vector.load %arg1[%c0_1, %c0_2, %c0_3] : memref<4x16x16xf32, #tpu.memory_space<vmem>>, vector<1x16x16xf32>
    %2 = vector.shape_cast %1 : vector<1x16x16xf32> to vector<16x16xf32>
    %cst = arith.constant dense<0.000000e+00> : vector<8x16xf32>
    %3 = tpu.matmul %0, %2, %cst {dimension_numbers = #tpu.dot_dimension_numbers<[1], [1], [0], [0], [0, 0, 1, 0], [], []>} : vector<8x16xf32>, vector<16x16xf32>, vector<8x16xf32> -> vector<8x16xf32>
    %c1 = arith.constant 1 : index
    %c0_4 = arith.constant 0 : index
    %c0_5 = arith.constant 0 : index
    %4 = vector.load %arg1[%c1, %c0_4, %c0_5] : memref<4x16x16xf32, #tpu.memory_space<vmem>>, vector<1x16x16xf32>
    %5 = vector.shape_cast %4 : vector<1x16x16xf32> to vector<16x16xf32>
    %cst_6 = arith.constant dense<0.000000e+00> : vector<8x16xf32>
    %6 = tpu.matmul %3, %5, %cst_6 {dimension_numbers = #tpu.dot_dimension_numbers<[1], [1], [0], [0], [0, 0, 1, 0], [], []>} : vector<8x16xf32>, vector<16x16xf32>, vector<8x16xf32> -> vector<8x16xf32>
    %c2 = arith.constant 2 : index
    %c0_7 = arith.constant 0 : index
    %c0_8 = arith.constant 0 : index
    %7 = vector.load %arg1[%c2, %c0_7, %c0_8] : memref<4x16x16xf32, #tpu.memory_space<vmem>>, vector<1x16x16xf32>
    %8 = vector.shape_cast %7 : vector<1x16x16xf32> to vector<16x16xf32>
    %cst_9 = arith.constant dense<0.000000e+00> : vector<8x16xf32>
    %9 = tpu.matmul %6, %8, %cst_9 {dimension_numbers = #tpu.dot_dimension_numbers<[1], [1], [0], [0], [0, 0, 1, 0], [], []>} : vector<8x16xf32>, vector<16x16xf32>, vector<8x16xf32> -> vector<8x16xf32>
    %c3 = arith.constant 3 : index
    %c0_10 = arith.constant 0 : index
    %c0_11 = arith.constant 0 : index
    %10 = vector.load %arg1[%c3, %c0_10, %c0_11] : memref<4x16x16xf32, #tpu.memory_space<vmem>>, vector<1x16x16xf32>
    %11 = vector.shape_cast %10 : vector<1x16x16xf32> to vector<16x16xf32>
    %cst_12 = arith.constant dense<0.000000e+00> : vector<8x16xf32>
    %12 = tpu.matmul %9, %11, %cst_12 {dimension_numbers = #tpu.dot_dimension_numbers<[1], [1], [0], [0], [0, 0, 1, 0], [], []>} : vector<8x16xf32>, vector<16x16xf32>, vector<8x16xf32> -> vector<8x16xf32>
    %c0_13 = arith.constant 0 : index
    %c0_14 = arith.constant 0 : index
    %13 = vector.load %arg2[%c0_13, %c0_14] : memref<8x16xf32, #tpu.memory_space<vmem>>, vector<8x16xf32>
    tpu.vector_store %arg2[%c0_13, %c0_14], %12 {strides = array<i32>} : memref<8x16xf32, #tpu.memory_space<vmem>>, vector<8x16xf32>,
    return
  }
}

</mosaic_0001>

<bundles_post_ra>
// kernel: tpu_custom_call.1
= control target key start
LH: loop header
LB: loop body
LE: loop exit
PB: predicated region body
PF: predicated region fallthrough
CT: control target
= control target key end

     0   :  { %7 = vsyncpa [#allocation3], 0  ;;  %s621_s0 = inlined_call_operand.hbm [shape: f32[8,16], index: 0, kind: input, shape index: {}]   ;;  %s622_s1 = inlined_call_operand.hbm [shape: f32[4,16,16], index: 1, kind: input, shape index: {}]   ;;  %s623_s2 = inlined_call_operand.hbm [shape: f32[8,16], index: 2, kind: output, shape index: {}]  }
   0x1   :  { %8 = vsyncpa [#allocation6], 0 }
   0x2   :  { %9 = vsyncpa [#allocation4], 0  ;;  %s532_s9 = smov [#allocation2]   ;;  %s533_s11 = smov [#allocation5]  }
   0x3   :  { %s16_s10 = sshll.u32 %s532_s9, 4  ;;  %s25_s12 = sshll.u32 %s533_s11, 4  ;;  %s17_s10 = int_to_ptr.vmem [resolvable:$true] %s16_s10  ;;  %s555_s12 = int_to_ptr.vmem [resolvable:$true] %s25_s12 }
   0x4   :  { %s460_s15 = scalar_lea.hbm %s621_s0, 128 }
   0x5   :  { %p461_p0 = scmp.ne.s32.totalorder %s621_s0, %s460_s15  ;;  %p464_p1 = scmp.lt.u32.totalorder %s460_s15, %s621_s0 }
   0x7   :  { %p466_p2 = pnand %p464_p1, %p461_p0 }
   0x9   :  { %469 = shalt.err (!%p466_p2)
}
   0xa   :  { %s470_s20 = scalar_lea.vmem %s17_s10, 128  ;;  %p475_p4 = scmp.lt.s32.totalorder %s17_s10, %s17_s10 }
   0xb   :  { %p471_p3 = scmp.ne.s32.totalorder %s17_s10, %s470_s20  ;;  %p476_p5 = scmp.lt.s32.totalorder %s470_s20, %s470_s20 }
   0xd   :  { %p477_p6 = por %p476_p5, %p475_p4 }
   0xf   :  { %p478_p7 = pnand %p477_p6, %p471_p3 }
  0x11   :  { %481 = shalt.err (!%p478_p7)
}
  0x12   :  { %19 = dma.hbm_to_vmem [thread:$0]  %s621_s0, 128, %s17_s10, [#allocation3]  }
  0x13   :  { %s482_s25 = scalar_lea.hbm %s622_s1, 1024 }
  0x14   :  { %p483_p8 = scmp.ne.s32.totalorder %s622_s1, %s482_s25  ;;  %p486_p9 = scmp.lt.u32.totalorder %s482_s25, %s622_s1 }
  0x16   :  { %p488_p10 = pnand %p486_p9, %p483_p8 }
  0x18   :  { %491 = shalt.err (!%p488_p10)
}
  0x19   :  { %s492_s30 = scalar_lea.vmem %s555_s12, 1024  ;;  %p497_p12 = scmp.lt.s32.totalorder %s555_s12, %s555_s12 }
  0x1a   :  { %p493_p11 = scmp.ne.s32.totalorder %s555_s12, %s492_s30  ;;  %p498_p13 = scmp.lt.s32.totalorder %s492_s30, %s492_s30 }
  0x1c   :  { %p499_p0 = por %p498_p13, %p497_p12 }
  0x1e   :  { %p500_p1 = pnand %p499_p0, %p493_p11 }
  0x20   :  { %503 = shalt.err (!%p500_p1)
}
  0x21   :  { %s534_s0 = smov 128   ;;  %s535_s3 = smov 8  }
  0x22   :  { %31 = dma.hbm_to_vmem [thread:$0]  %s622_s1, 1024, %s555_s12, [#allocation6], %s534_s0, %s534_s0, %s535_s3  }
  0x23   :  { %526 = dma.done.wait [#allocation3], 128  }
  0x24   :  { %527 = vsyncadd [#allocation3], 4294967168 }
  0x25   :  { %528 = dma.done.wait [#allocation6], 1024  }
  0x26   :  { %529 = vsyncadd [#allocation6], 4294966272  ;;  %v536_v0 = vmov 0.0|0.0   ;;  %vm537_vm0 = vmmov 0   ;;  %v538_v1 = vmov 0.0   ;;  %vm41_vm1 = vcmask 130048  }
  0x27   :  { %436 = vmatprep.subr.bf16.mxu0 %v536_v0  ;;  %412 = vmatprep.mubr.msk.f32.mxu0 %vm537_vm0, %v538_v1  ;;  %v39_v2 = vld [vmem:[#allocation5] sm:$0xff]  ;;  %v40_v3 = vld [vmem:[#allocation5 + $0x8] sm:$0xff]  ;;  %vm590_vm2 = vmpackc.low %vm41_vm1, %vm41_vm1  ;;  %s539_s1 = smov [#allocation7]  }
  0x28   :  { %440 = vmatprep.subr.bf16.mxu1 %v536_v0  ;;  %419 = vmatprep.mubr.msk.f32.mxu1 %vm537_vm0, %v538_v1  ;;  %v437_v5 = vpack.c.bf16 %v40_v3, %v39_v2  ;;  %v122_v6 = vld [vmem:[#allocation5 + $0x10] sm:$0xff]  ;;  %v123_v7 = vld [vmem:[#allocation5 + $0x18] sm:$0xff]  ;;  %v204_v10 = vld [vmem:[#allocation5 + $0x20] sm:$0xff]  ;;  %s374_s6 = sshll.u32 %s539_s1, 4  ;;  %s375_s6 = int_to_ptr.vmem [resolvable:$true] %s374_s6 }
  0x29   :  { %v441_v8 = vpack.c.bf16 %v123_v7, %v122_v6  ;;  %v38_v9 = vld [vmem:[#allocation2] sm:$0xff]  ;;  %v205_v11 = vld [vmem:[#allocation5 + $0x28] sm:$0xff]  ;;  %v286_v15 = vld [vmem:[#allocation5 + $0x30] sm:$0xff]  ;;  %s504_s7 = scalar_lea.vmem %s375_s6, 128  ;;  %p509_p3 = scmp.lt.s32.totalorder %s375_s6, %s375_s6 }
  0x2a   :  { %439 = vmatpush3.bf16.xpose.msk.msra.mxu0 %vm590_vm2, %v437_v5  ;;  %v445_v12 = vpack.c.bf16 %v205_v11, %v204_v10  ;;  %v287_v16 = vld [vmem:[#allocation5 + $0x38] sm:$0xff]  ;;  %p505_p2 = scmp.ne.s32.totalorder %s375_s6, %s504_s7  ;;  %p510_p4 = scmp.lt.s32.totalorder %s504_s7, %s504_s7 }
  0x2b   :  { %443 = vmatpush3.bf16.xpose.msk.msra.mxu1 %vm590_vm2, %v441_v8  ;;  %444 = vmatprep.subr.bf16.mxu0 %v536_v0  ;;  %v449_v17 = vpack.c.bf16 %v287_v16, %v286_v15 }
  0x2c   :  { %448 = vmatprep.subr.bf16.mxu1 %v536_v0  ;;  %p511_p5 = por %p510_p4, %p509_p3 }
  0x2e   :  { %p512_p6 = pnand %p511_p5, %p505_p2 }
  0x31   :  { %413 = vmatmul.mubr.msk.f32.vlgmr.msra.gmra.mrb[0].mxu0 %vm41_vm1, %v38_v9 }
  0x32   :  { %426 = vmatprep.mubr.msk.f32.mxu0 %vm537_vm0, %v538_v1  ;;  %447 = vmatpush3.bf16.xpose.msk.msra.mxu0 %vm590_vm2, %v445_v12 }
 0x104   :  { %v117_v13 = vpop.f32.mrb[0].mxu0 }
 0x105   :  { %v414_v14 = vpop.f32.mrb[1].mxu0  ;;  %420 = vmatmul.mubr.msk.f32.vlgmr.msra.gmra.mrb[0].mxu1 %vm41_vm1, %v117_v13 }
 0x106   :  { %433 = vmatprep.mubr.msk.f32.mxu1 %vm537_vm0, %v538_v1  ;;  %451 = vmatpush3.bf16.xpose.msk.msra.mxu1 %vm590_vm2, %v449_v17 }
 0x1d8   :  { %v199_v18 = vpop.f32.mrb[0].mxu1 }
 0x1d9   :  { %v421_v19 = vpop.f32.mrb[1].mxu1  ;;  %427 = vmatmul.mubr.msk.f32.vlgmr.msra.gmra.mrb[2].mxu0 %vm41_vm1, %v199_v18 }
 0x2ac   :  { %v281_v20 = vpop.f32.mrb[2].mxu0 }
 0x2ad   :  { %v428_v21 = vpop.f32.mrb[3].mxu0  ;;  %434 = vmatmul.mubr.msk.f32.vlgmr.msra.gmra.mrb[2].mxu1 %vm41_vm1, %v281_v20 }
 0x380   :  { %v363_v22 = vpop.f32.mrb[2].mxu1 }
 0x381   :  { %367 = vst.msk [vmem:[#allocation7] sm:$0xff] %vm41_vm1, %v363_v22  ;;  %v435_v23 = vpop.f32.mrb[3].mxu1 }
 0x382   :  { %515 = shalt.err (!%p512_p6)
}
 0x383   :  { %s516_s10 = scalar_lea.hbm %s623_s2, 128 }
 0x384   :  { %p517_p7 = scmp.ne.s32.totalorder %s623_s2, %s516_s10  ;;  %p520_p8 = scmp.lt.u32.totalorder %s516_s10, %s623_s2 }
 0x386   :  { %p522_p9 = pnand %p520_p8, %p517_p7 }
 0x388   :  { %525 = shalt.err (!%p522_p9)
}
 0x389   :  { %377 = dma.vmem_to_hbm [thread:$0]  %s375_s6, 128, %s623_s2, [#allocation4]  }
 0x38a   :  { %530 = dma.done.wait [#allocation4], 128  }
 0x38b   :  { %531 = vsyncadd [#allocation4], 4294967168 }
 0x38c   :  { %381 = vsyncpa [#allocation3], 1 }
 0x38d   :  { %382 = vsyncpa [#allocation6], 1 }
 0x38e   :  { %383 = vsyncpa [#allocation4], 1 }

</bundles_post_ra>
